<compile_context>
chip_gen: v6e
topology: v6e:2x2x1
jax: 0.10.0
libtpu: 0.0.40
codegen_flags: <defaults>
</compile_context>

<pallas_src>
import jax
import jax.numpy as jnp
from jax.experimental import pallas as pl
from jax.experimental.pallas import tpu as pltpu


def _se_kernel(x_ref, w1_ref, w2_ref, o_ref):
    tb, n, d = x_ref.shape
    x = x_ref[...]                                               # (TB, N, D) native dtype

    # Squeeze: mean over patches via an MXU ones-contraction (f32 accumulation),
    # instead of casting the whole slab to f32 and doing an XLU reduce.
    ones = jnp.ones((tb, 1, n), dtype=x.dtype)
    pooled = jnp.einsum("bon,bnd->bod", ones, x,
                        preferred_element_type=jnp.float32)[:, 0, :]   # (TB, D) f32
    pooled = pooled * (1.0 / n)

    # Excitation: two tiny bias-free matmuls.  Both weights are lane-dense (H, D);
    # the first contracts over D (== pooled @ W1^T), the second over H (== h @ W2^T).
    w1 = w1_ref[...].astype(jnp.float32)                         # (H, D)
    w2 = w2_ref[...].astype(jnp.float32)                         # (H, D)
    h = jax.lax.dot_general(pooled, w1, (((1,), (1,)), ((), ())),
                            preferred_element_type=jnp.float32)  # (TB, H)
    h = jnp.maximum(h, 0.0)                                      # ReLU
    g = jax.lax.dot_general(h, w2, (((1,), (0,)), ((), ())),
                            preferred_element_type=jnp.float32)  # (TB, D)
    g = jax.nn.sigmoid(g)                                        # EUP transcendental

    # Scale: broadcast the (TB, 1, D) gate over the patch axis; heavy elementwise
    # multiply stays in the input's native dtype (bf16-friendly on v6e/v7x).
    o_ref[...] = (x * g[:, None, :].astype(x.dtype)).astype(o_ref.dtype)


def _vmem_budget_bytes():
    """Generation-aware scoped-VMEM cap: physical VMEM minus headroom."""
    phys = 64 << 20  # conservative fallback = v7x per-TC VMEM
    try:
        info = pltpu.get_tpu_info()
        phys = int(getattr(info, "vmem_capacity_bytes", phys))
    except Exception:
        pass
    # ~48 MiB on v7x (64 MiB phys), ~112 MiB on v5e/v6e (128 MiB phys).
    return max(24 << 20, phys - (16 << 20))


def _vmem_needed_bytes(tb, N, D, H, x_itemsize, w_itemsize):
    slab = tb * N * D * x_itemsize
    h_pad = -(-H // 8) * 8
    d_pad = -(-D // 128) * 128
    # double-buffered weights + their in-kernel f32 casts
    w_bytes = 2 * 2 * h_pad * d_pad * w_itemsize + 2 * h_pad * d_pad * 4
    # double-buffered in + out slabs, ~1 slab of elementwise temporaries, margin
    return 5 * slab + w_bytes + (2 << 20)


def _pick_tb(B, N, D, H, x_itemsize, w_itemsize, budget):
    """Largest batch-block <= 8 that divides B, fits VMEM, and keeps >=2 grid steps."""
    cands = [tb for tb in range(1, min(B, 8) + 1)
             if B % tb == 0
             and _vmem_needed_bytes(tb, N, D, H, x_itemsize, w_itemsize) <= budget]
    if not cands:
        # TODO(synk): two-pass fallback (tiled pooled-sum pass, then tiled
        # gate+rescale pass) for slabs that overflow VMEM even at TB=1; until
        # then TB=1 with a raised limit may spill on v7x for very large N*D.
        return 1
    mega = [tb for tb in cands if B // tb >= 2]
    return max(mega) if mega else max(cands)


def se_layer(x, w1, w2):
    """Fused SELayer forward.

    x:  (B, N, D)  tokens
    w1: (H, D)     first linear weight  (== PyTorch fc1.weight, lane-dense)
    w2: (H, D)     second linear weight transposed (== PyTorch fc2.weight.T, lane-dense)
    """
    B, N, D = x.shape
    H = w1.shape[0]
    assert w1.shape == (H, D) and w2.shape == (H, D)

    x_itemsize = jnp.dtype(x.dtype).itemsize
    w_itemsize = jnp.dtype(w1.dtype).itemsize

    budget = _vmem_budget_bytes()
    TB = _pick_tb(B, N, D, H, x_itemsize, w_itemsize, budget)
    need = _vmem_needed_bytes(TB, N, D, H, x_itemsize, w_itemsize)

    compiler_kwargs = {}
    if need > (16 << 20):  # above v5e's default scoped-VMEM limit
        compiler_kwargs["vmem_limit_bytes"] = int(budget)

    cost = pl.CostEstimate(
        flops=int(B * (3 * N * D + 4 * D * H)),
        transcendentals=int(B * D),
        bytes_accessed=int(2 * B * N * D * x_itemsize + 2 * H * D * w_itemsize),
    )

    return pl.pallas_call(
        _se_kernel,
        out_shape=jax.ShapeDtypeStruct((B, N, D), x.dtype),
        grid_spec=pltpu.PrefetchScalarGridSpec(
            num_scalar_prefetch=0,
            grid=(B // TB,),
            in_specs=[
                pl.BlockSpec((TB, N, D), lambda b: (b, 0, 0)),   # batched token slab
                pl.BlockSpec((H, D), lambda b: (0, 0)),          # resident weight (lane-dense)
                pl.BlockSpec((H, D), lambda b: (0, 0)),          # resident weight (lane-dense)
            ],
            out_specs=pl.BlockSpec((TB, N, D), lambda b: (b, 0, 0)),
        ),
        compiler_params=pltpu.CompilerParams(
            dimension_semantics=("parallel",),  # batch-block axis shards over v7x's 2 TCs
            **compiler_kwargs,
        ),
        cost_estimate=cost,
    )(x, w1, w2)


if __name__ == "__main__":
    key = jax.random.PRNGKey(0)
    kx, k1, k2 = jax.random.split(key, 3)

    # (batch, num_patches, dim) as implied by the forward; reduction=16 -> H=8.
    B, N, D, reduction = 2, 16, 128, 16
    H = D // reduction

    x = jax.random.normal(kx, (B, N, D), dtype=jnp.float32)
    w1 = jax.random.normal(k1, (H, D), dtype=jnp.float32) * (1.0 / D ** 0.5)  # fc1.weight
    w2 = jax.random.normal(k2, (H, D), dtype=jnp.float32) * (1.0 / H ** 0.5)  # fc2.weight.T

    out = jax.block_until_ready(se_layer(x, w1, w2))

    # Pure-JAX reference of the PyTorch forward.
    pooled = jnp.mean(x, axis=1)                                    # (B, D)
    gate = jax.nn.sigmoid(jnp.maximum(pooled @ w1.T, 0.0) @ w2)     # (B, D)
    ref = x * gate[:, None, :]

    assert out.shape == x.shape and out.dtype == x.dtype
    assert jnp.allclose(out, ref, atol=1e-4, rtol=1e-4), \
        float(jnp.max(jnp.abs(out - ref)))

    print("KERNEL_OK")
</pallas_src>

<mosaic_0001>
module attributes {stable_mosaic.version = 11 : i64} {
  func.func @_se_kernel(%arg0: i32, %arg1: memref<1x16x128xf32, #tpu.memory_space<vmem>>, %arg2: memref<8x128xf32, #tpu.memory_space<vmem>>, %arg3: memref<8x128xf32, #tpu.memory_space<vmem>>, %arg4: memref<1x16x128xf32, #tpu.memory_space<vmem>>) attributes {dimension_semantics = [#tpu.dimension_semantics<parallel>], iteration_bounds = array<i64: 2>, scalar_prefetch = 0 : i64, scratch_operands = 0 : i64, tpu.core_type = #tpu.core_type<tc>, window_params = [{transform_indices = @transform_0, window_bounds = array<i64: 1, 16, 128>}, {pipeline_mode = #tpu.pipeline_mode<synchronous>, transform_indices = @transform_1, window_bounds = array<i64: 8, 128>}, {pipeline_mode = #tpu.pipeline_mode<synchronous>, transform_indices = @transform_2, window_bounds = array<i64: 8, 128>}, {transform_indices = @transform_3, window_bounds = array<i64: 1, 16, 128>}]} {
    %c0 = arith.constant 0 : index
    %c0_0 = arith.constant 0 : index
    %c0_1 = arith.constant 0 : index
    %0 = vector.load %arg1[%c0, %c0_0, %c0_1] : memref<1x16x128xf32, #tpu.memory_space<vmem>>, vector<1x16x128xf32>
    %cst = arith.constant 1.000000e+00 : f32
    %1 = vector.broadcast %cst : f32 to vector<1x1x16xf32>
    "tpu.trace_start"() <{level = 10 : i32, message = "bon,bnd->bod"}> : () -> ()
    %cst_2 = arith.constant dense<0.000000e+00> : vector<1x1x128xf32>
    %2 = tpu.matmul %1, %0, %cst_2 {dimension_numbers = #tpu.dot_dimension_numbers<[2], [1], [1], [2], [0, 0, 0, 1, 1, 2], [0], [0]>} : vector<1x1x16xf32>, vector<1x16x128xf32>, vector<1x1x128xf32> -> vector<1x1x128xf32>
    "tpu.trace_stop"() : () -> ()
    %3 = vector.shape_cast %2 : vector<1x1x128xf32> to vector<1x128xf32>
    %cst_3 = arith.constant 6.250000e-02 : f32
    %4 = vector.broadcast %cst_3 : f32 to vector<1x128xf32>
    %5 = arith.mulf %3, %4 : vector<1x128xf32>
    %c0_4 = arith.constant 0 : index
    %c0_5 = arith.constant 0 : index
    %6 = vector.load %arg2[%c0_4, %c0_5] : memref<8x128xf32, #tpu.memory_space<vmem>>, vector<8x128xf32>
    %c0_6 = arith.constant 0 : index
    %c0_7 = arith.constant 0 : index
    %7 = vector.load %arg3[%c0_6, %c0_7] : memref<8x128xf32, #tpu.memory_space<vmem>>, vector<8x128xf32>
    %cst_8 = arith.constant dense<0.000000e+00> : vector<1x8xf32>
    %8 = tpu.matmul %5, %6, %cst_8 {dimension_numbers = #tpu.dot_dimension_numbers<[1], [1], [0], [0], [0, 0, 1, 0], [], []>} : vector<1x128xf32>, vector<8x128xf32>, vector<1x8xf32> -> vector<1x8xf32>
    %cst_9 = arith.constant 0.000000e+00 : f32
    %9 = vector.broadcast %cst_9 : f32 to vector<1x8xf32>
    %10 = arith.maximumf %8, %9 : vector<1x8xf32>
    %cst_10 = arith.constant dense<0.000000e+00> : vector<1x128xf32>
    %11 = tpu.matmul %10, %7, %cst_10 {dimension_numbers = #tpu.dot_dimension_numbers<[1], [0], [0], [1], [0, 0, 1, 1], [], []>} : vector<1x8xf32>, vector<8x128xf32>, vector<1x128xf32> -> vector<1x128xf32>
    %12 = arith.negf %11 : vector<1x128xf32>
    %13 = math.exp %12 : vector<1x128xf32>
    %cst_11 = arith.constant 1.000000e+00 : f32
    %14 = vector.broadcast %cst_11 : f32 to vector<1x128xf32>
    %15 = arith.addf %14, %13 : vector<1x128xf32>
    %16 = arith.divf %14, %15 : vector<1x128xf32>
    %17 = vector.shape_cast %16 : vector<1x128xf32> to vector<1x1x128xf32>
    %18 = vector.broadcast %17 : vector<1x1x128xf32> to vector<1x16x128xf32>
    %19 = arith.mulf %0, %18 : vector<1x16x128xf32>
    %c0_12 = arith.constant 0 : index
    %c0_13 = arith.constant 0 : index
    %c0_14 = arith.constant 0 : index
    %20 = vector.load %arg4[%c0_12, %c0_13, %c0_14] : memref<1x16x128xf32, #tpu.memory_space<vmem>>, vector<1x16x128xf32>
    tpu.vector_store %arg4[%c0_12, %c0_13, %c0_14], %19 {strides = array<i32>} : memref<1x16x128xf32, #tpu.memory_space<vmem>>, vector<1x16x128xf32>,
    return
  }
  func.func @transform_0(%arg0: i32) -> (i32, i32, i32) {
    %c0_i32 = arith.constant 0 : i32
    %c0_i32_0 = arith.constant 0 : i32
    %c0_i32_1 = arith.constant 0 : i32
    return %arg0, %c0_i32, %c0_i32_0 : i32, i32, i32
  }
  func.func @transform_1(%arg0: i32) -> (i32, i32) {
    %c0_i32 = arith.constant 0 : i32
    %c0_i32_0 = arith.constant 0 : i32
    %c0_i32_1 = arith.constant 0 : i32
    return %c0_i32, %c0_i32_0 : i32, i32
  }
  func.func @transform_2(%arg0: i32) -> (i32, i32) {
    %c0_i32 = arith.constant 0 : i32
    %c0_i32_0 = arith.constant 0 : i32
    %c0_i32_1 = arith.constant 0 : i32
    return %c0_i32, %c0_i32_0 : i32, i32
  }
  func.func @transform_3(%arg0: i32) -> (i32, i32, i32) {
    %c0_i32 = arith.constant 0 : i32
    %c0_i32_0 = arith.constant 0 : i32
    %c0_i32_1 = arith.constant 0 : i32
    return %arg0, %c0_i32, %c0_i32_0 : i32, i32, i32
  }
}

</mosaic_0001>

<bundles_post_ra>
// kernel: tpu_custom_call.1
= control target key start
LH: loop header
LB: loop body
LE: loop exit
PB: predicated region body
PF: predicated region fallthrough
CT: control target
= control target key end

     0   :  { %8 = vsyncpa [#allocation3], 0  ;;  %s1060_s0 = inlined_call_operand.hbm [shape: f32[2,16,128], index: 0, kind: input, shape index: {}]   ;;  %s1061_s1 = inlined_call_operand.hbm [shape: f32[8,128], index: 1, kind: input, shape index: {}]   ;;  %s1062_s2 = inlined_call_operand.hbm [shape: f32[8,128], index: 2, kind: input, shape index: {}]   ;;  %s1063_s3 = inlined_call_operand.hbm [shape: f32[2,16,128], index: 3, kind: output, shape index: {}]  }
   0x1   :  { %10 = vsyncpa [#allocation3 + $0x1], 0 }
   0x2   :  { %11 = vsyncpa [#allocation6], 0 }
   0x3   :  { %12 = vsyncpa [#allocation4], 0 }
   0x4   :  { %14 = vsyncpa [#allocation4 + $0x1], 0  ;;  %s864_s12 = smov 0   ;;  %s866_s13 = smov 0  }
   0x5   :  { %s868_s14 = smov 0   ;;  %s870_s15 = smov 0  }
   0x6 LB: > { %s885_s16 = sadd.s32 4294967295, %s831_s15   ;;  %s558_s17 = sadd.s32 4294967294, %s831_s15   ;;  %s831_s15 = sphi %s870_s15, %s1086_s15   ;;  %s827_s14 = sphi %s868_s14, %s1085_s14   ;;  %s823_s13 = sphi %s866_s13, %s1084_s13   ;;  %s819_s12 = sphi %s864_s12, %s1083_s12  }
   0x7   : > { %s889_s18 = sadd.s32 1, %s831_s15   ;;  %s27_s19 = sadd.s32 1, %s827_s14 }
   0x8   : > { %s24_s20 = ssub.s32 %s831_s15, %s889_s18  ;;  %p34_p0 = scmp.ne.s32.totalorder %s827_s14, %s823_s13 }
   0x9   : > { %p25_p1 = scmp.eq.s32.totalorder %s24_s20, 0  ;;  %p35_p2 = scmp.eq.s32.totalorder %s831_s15, 0 }
   0xa   : > { %p40_p3 = scmp.ne.s32.totalorder %s823_s13, %s819_s12  ;;  %p1064_p4 = scmp.eq.s32.totalorder %s885_s16, 0 }
   0xb   : > { %s901_s21 = scalar_select %p25_p1, %s827_s14, %s27_s19  }
   0xc   : > { %p903_p5 = por %p35_p2, %p34_p0  ;;  %p909_p6 = por %p1064_p4, %p40_p3 }
   0xd   : > { %p106_p7 = scmp.eq.s32.totalorder %s885_s16, 1  ;;  %p112_p8 = scmp.eq.s32.totalorder %s558_s17, 1 }
   0xe   : > { %s1069_s23 = scalar_select %p909_p6, 1, 0 }
   0xf   : > { %p559_p9 = scmp.ge.s32.totalorder %s831_s15, 1  ;;  %p119_p10 = scmp.lt.s32.totalorder %s831_s15, 3 }
  0x10   : > { %p916_p11 = por %p106_p7, %p34_p0  ;;  %p920_p12 = por %p112_p8, %p40_p3 }
  0x11   : > { %p924_p13 = pnand %p559_p9, %p119_p10  ;;  %s833_s27 = smov [#allocation5]  }
  0x12   : > { %s1070_s24 = scalar_select %p916_p11, 1, 0 }
  0x13   : > { %s1071_s25 = scalar_select %p920_p12, 1, 0 }
  0x14   : > { %s1072_s26 = scalar_select %p924_p13, 1, 0 }
  0x15   : > { %p617_p2 = pneg %p924_p13  ;;  %s132_s28 = sshll.u32 %s833_s27, 4  ;;  %s133_s28 = int_to_ptr.vmem [resolvable:$true] %s132_s28 }
  0x16   : > { %p634_p4 = scmp.lt.s32.totalorder %s831_s15, 2  ;;  %p1073_p0 = scmp.eq.s32.totalorder %s885_s16, 0 }
  0x17   : > { %s834_s4 = smov [#allocation7]   ;;  %s694_s6 = scalar_lea.vmem %s133_s28, 128 }
  0x18   : > { %p934_p7 = pnand %p617_p2, %p1073_p0  ;;  %p940_p3 = pnand %p634_p4, %p903_p5 }
  0x19   : > { %s143_s5 = sshll.u32 %s834_s4, 4  ;;  %p695_p9 = scmp.ne.s32.totalorder %s133_s28, %s694_s6  ;;  %s144_s5 = int_to_ptr.vmem [resolvable:$true] %s143_s5 }
  0x1a   : > { %p685_p8 = pneg %p934_p7  ;;  %p702_p0 = scmp.lt.s32.totalorder %s133_s28, %s133_s28 }
  0x1b   : > { %p703_p1 = scmp.lt.s32.totalorder %s694_s6, %s694_s6 }
  0x1c   : > { %p697_p10 = pnand %p695_p9, %p685_p8 }
  0x1d   : > { %p704_p12 = por %p703_p1, %p702_p0 }
  0x1e   : > { %p698_p2 = pneg %p697_p10 }
  0x20   : > { %p705_p11 = pnand %p704_p12, %p698_p2 }
  0x22   : > { %708 = shalt.err (!%p705_p11)
}
  0x23   : > { %620 = dma.hbm_to_vmem [thread:$0]  (!%p934_p7), %s1061_s1, 128, %s133_s28, [#allocation6]  }
  0x24   : > { %s154_s9 = sand.u32 1, %s827_s14   ;;  %s720_s10 = scalar_lea.vmem %s144_s5, 128 }
  0x25   : > { %p721_p4 = scmp.ne.s32.totalorder %s144_s5, %s720_s10  ;;  %p728_p10 = scmp.lt.s32.totalorder %s144_s5, %s144_s5 }
  0x26   : > { %p729_p6 = scmp.lt.s32.totalorder %s720_s10, %s720_s10 }
  0x27   : > { %p723_p5 = pnand %p721_p4, %p685_p8 }
  0x28   : > { %p730_p1 = por %p729_p6, %p728_p10 }
  0x29   : > { %p724_p9 = pneg %p723_p5 }
  0x2b   : > { %p731_p12 = pnand %p730_p1, %p724_p9 }
  0x2d   : > { %734 = shalt.err (!%p731_p12)
}
  0x2e   : > { %623 = dma.hbm_to_vmem [thread:$0]  (!%p934_p7), %s1062_s2, 128, %s144_s5, [#allocation6]  }
  0x2f   : > { %s563_s19 = sshll.u32 %s154_s9, 4  ;;  %s579_s20 = sshll.u32 %s831_s15, 8 }
  0x30   : > { %s967_s28 = scalar_lea.hbm %s1060_s0, %s579_s20  ;;  %s158_s4 = scalar_lea.vmem [#allocation2], %s563_s19 }
  0x31   : > { %s165_s6 = sshll.u32 %s158_s4, 4  ;;  %s971_s29 = scalar_lea.sflag [#allocation3], %s154_s9  ;;  %s969_s6 = int_to_ptr.vmem [resolvable:$true] %s165_s6 }
  0x32   : > { %s735_s7 = scalar_lea.hbm %s967_s28, 256  ;;  %p737_p11 = pneg %p940_p3 }
  0x33   : > { %p736_p6 = scmp.ne.s32.totalorder %s967_s28, %s735_s7  ;;  %s740_s10 = scalar_lea.hbm %s1060_s0, 512 }
  0x34   : > { %p741_p2 = scmp.lt.s32.totalorder %s967_s28, %s1060_s0  ;;  %p742_p0 = scmp.lt.s32.totalorder %s740_s10, %s735_s7 }
  0x35   : > { %p738_p7 = pnand %p737_p11, %p736_p6 }
  0x36   : > { %p743_p4 = por %p742_p0, %p741_p2 }
  0x37   : > { %p739_p8 = pneg %p738_p7 }
  0x39   : > { %p744_p5 = pnand %p743_p4, %p739_p8 }
  0x3b   : > { %747 = shalt.err (!%p744_p5)
}
  0x3c   : > { %s748_s9 = scalar_lea.vmem %s969_s6, 256  ;;  %s835_s19 = smov [#allocation2]  }
  0x3d   : > { %p749_p9 = scmp.ne.s32.totalorder %s969_s6, %s748_s9  ;;  %s753_s20 = sshll.u32 %s835_s19, 4  ;;  %s754_s20 = int_to_ptr.vmem [resolvable:$false] %s753_s20 }
  0x3e   : > { %s755_s22 = scalar_lea.vmem %s754_s20, 512  ;;  %p756_p12 = scmp.lt.s32.totalorder %s969_s6, %s754_s20 }
  0x3f   : > { %p751_p10 = pnand %p749_p9, %p737_p11  ;;  %p757_p6 = scmp.lt.s32.totalorder %s755_s22, %s748_s9 }
  0x41   : > { %p752_p1 = pneg %p751_p10  ;;  %p758_p7 = por %p757_p6, %p756_p12 }
  0x43   : > { %p759_p13 = pnand %p758_p7, %p752_p1 }
  0x45   : > { %762 = shalt.err (!%p759_p13)
}
  0x46   : > { %s836_s27 = smov 128   ;;  %s837_s4 = smov 8  }
  0x47   : > { %627 = dma.hbm_to_vmem [thread:$0]  (!%p940_p3), %s967_s28, 256, %s969_s6, %s971_s29, %s836_s27, %s836_s27, %s837_s4  }
  0x48   : > { %p1076_p11 = scmp.ne.s32.totalorder %s1072_s26, 0 }
  0x49   : > { %s995_s7 = sand.u32 (!%p1076_p11), 1, %s823_s13   ;;  %p1077_p13 = scmp.ne.s32.totalorder (!%p1076_p11), %s1069_s23, 0 }
  0x4a   : > { %177 = sbr.rel (%p1076_p11) target bundleno = 722 (0x2d2), region = 32  ;;  %s567_s5 = sshll.u32 (!%p1076_p11), %s995_s7, 4 }
  0x4b   : > { %s180_s8 = scalar_lea.sflag (!%p1076_p11), [#allocation3], %s995_s7  ;;  %s183_s10 = scalar_lea.vmem (!%p1076_p11), [#allocation2], %s567_s5 }
  0x4f   : > { %806 = dma.done.wait (%p1077_p13), %s180_s8, 256  }
  0x50   : > { %808 = vsyncadd (%p1077_p13), %s180_s8, 4294967040  ;;  %p1078_p3 = scmp.eq.s32.totalorder %s885_s16, 0 }
  0x52   : > { %810 = dma.done.wait (%p1078_p3), [#allocation6], 256   ;;  %p1079_p8 = pmov %p1078_p3 }
  0x53   : > { %v838_v0 = vmov 0.0   ;;  %vm839_vm0 = vmmov 0   ;;  %v215_v1 = vld [vmem:[%s183_s10 + $0x8] sm:$0xff]  ;;  %v214_v2 = vld [vmem:[%s183_s10] sm:$0xff]  ;;  %vm216_vm1 = vcmask 130048   ;;  %v840_v3 = vmov 1.0  }
  0x54   : > { %812 = vsyncadd (%p1079_p8), [#allocation6], 4294967040  ;;  %588 = vmatprep.subr.mxu0 %v838_v0  ;;  %592 = vmatprep.mubr.msk.f32.mxu0 %vm839_vm0, %v838_v0  ;;  %v291_v4 = vld [vmem:[#allocation5] sm:$0xff]  ;;  %v292_v5 = vld [vmem:[#allocation7] sm:$0xff]  ;;  %vm364_vm2 = vcmask 64512   ;;  %v444_v17 = vlaneseq  ;;  %s580_s23 = sshll.u32 %s885_s16, 8 }
  0x55   : > { %595 = vmatprep.subr.mxu1 %v838_v0  ;;  %597 = vmatprep.mubr.msk.f32.mxu1 %vm839_vm0, %v838_v0  ;;  %s213_s26 = scalar_lea.vmem [#allocation8], %s567_s5  ;;  %s1015_s29 = scalar_lea.hbm %s1063_s3, %s580_s23 }
  0x56   : > { %589 = vmatpush3.msra.mxu0 %v215_v1  ;;  %596 = vmatpush3.xpose.msra.mxu1 %v291_v4  ;;  %v445_v18 = vshrl.u32 %v444_v17, 7  ;;  %s466_s30 = sshll.u32 %s213_s26, 4  ;;  %s453_s16 = scalar_lea.sflag [#allocation4], %s995_s7  ;;  %s1017_s30 = int_to_ptr.vmem [resolvable:$true] %s466_s30 }
  0x57   : > { %590 = vmatprep.subr.mxu0 %v838_v0  ;;  %s763_s11 = scalar_lea.vmem %s1017_s30, 256  ;;  %p1080_p0 = scmp.ne.s32.totalorder %s1070_s24, 0 }
  0x58   : > { %591 = vmatpush3.msra.mxu0 %v214_v2  ;;  %v446_v19 = vsub.s32 0, %v445_v18  ;;  %p764_p2 = scmp.ne.s32.totalorder %s1017_s30, %s763_s11  ;;  %s841_s17 = smov [#allocation8]  }
  0x59   : > { %593 = vmatmul.mubr.msk.f32.vlgmr.msra.gmra.mxu0 %vm216_vm1, %v840_v3  ;;  %600 = vmatprep.subr.mxu0 %v838_v0  ;;  %s767_s9 = sshll.u32 %s841_s17, 4  ;;  %s768_s9 = int_to_ptr.vmem [resolvable:$false] %s767_s9 }
  0x5a   : > { %602 = vmatprep.mubr.msk.f32.mxu0 %vm839_vm0, %v838_v0  ;;  %601 = vmatpush3.msra.mxu0 %v292_v5  ;;  %p765_p4 = pnand %p764_p2, %p1080_p0  ;;  %s769_s19 = scalar_lea.vmem %s768_s9, 512 }
  0x5b   : > { %p770_p9 = scmp.lt.s32.totalorder %s1017_s30, %s768_s9  ;;  %p771_p10 = scmp.lt.s32.totalorder %s769_s19, %s763_s11 }
  0x5c   : > { %p766_p5 = pneg %p765_p4 }
  0x5d   : > { %p772_p1 = por %p771_p10, %p770_p9 }
  0x5f   : > { %p773_p12 = pnand %p772_p1, %p766_p5 }
 0x119   : > { %v286_v6 = vpop.f32.mrf.mxu0 }
 0x11a   : > { %v290_v7 = vmul.f32 0.0625, %v286_v6 }
 0x11b   : > { %v594_v8 = vpop.f32.mrf.mxu0 }
 0x11c   : > { %598 = vmatmul.mubr.f32.vlgmr.msra.gmra.mxu1 %v290_v7 }
 0x1dc   : > { %v359_v9 = vpop.f32.mrf.mxu1 }
 0x1dd   : > { %v363_v10 = vmax.f32 %v359_v9, 0.0 }
 0x1de   : > { %v599_v11 = vpop.f32.mrf.mxu1 }
 0x1df   : > { %603 = vmatmul.mubr.msk.f32.vlgmr.msra.gmra.mxu0 %vm364_vm2, %v363_v10 }
 0x29f   : > { %v434_v12 = vpop.f32.mrf.mxu0 }
 0x2a0   : > { %v573_v13 = vmul.f32 -1.442695, %v434_v12 }
 0x2a1   : > { %v604_v14 = vpop.f32.mrf.mxu0 }
 0x2a2   : > { %679 = vpow2.f32 %v573_v13 }
 0x2af   : > { %v680_v15 = vpop.eup %679 }
 0x2b0   : > { %v441_v16 = vadd.f32 1.0, %v680_v15 }
 0x2b2   : > { %681 = vrcp.f32 %v441_v16 }
 0x2bf   : > { %v682_v20 = vpop.eup %681 }
 0x2c0   : > { %v447_v21 = vrot.slane %v682_v20, %v446_v19 }
 0x2c2   : > { %v448_v22 = vmul.f32 %v447_v21, %v214_v2  ;;  %v449_v23 = vmul.f32 %v447_v21, %v215_v1 }
 0x2c4   : > { %450 = vst [vmem:[%s213_s26] sm:$0xff] %v448_v22  ;;  %451 = vst [vmem:[%s213_s26 + $0x8] sm:$0xff] %v449_v23 }
 0x2c5   : > { %776 = shalt.err (!%p773_p12)
}
 0x2c6   : > { %s777_s20 = scalar_lea.hbm %s1015_s29, 256  ;;  %s781_s4 = scalar_lea.hbm %s1063_s3, 512 }
 0x2c7   : > { %p778_p6 = scmp.ne.s32.totalorder %s1015_s29, %s777_s20  ;;  %p782_p13 = scmp.lt.s32.totalorder %s1015_s29, %s1063_s3 }
 0x2c8   : > { %p783_p3 = scmp.lt.s32.totalorder %s781_s4, %s777_s20 }
 0x2c9   : > { %p779_p7 = pnand %p778_p6, %p1080_p0 }
 0x2ca   : > { %p784_p8 = por %p783_p3, %p782_p13 }
 0x2cb   : > { %p780_p11 = pneg %p779_p7 }
 0x2cd   : > { %p785_p2 = pnand %p784_p8, %p780_p11 }
 0x2cf   : > { %788 = shalt.err (!%p785_p2)
}
 0x2d0   : > { %s842_s10 = smov 128   ;;  %s843_s23 = smov 8  }
 0x2d1   : > { %615 = dma.vmem_to_hbm [thread:$0]  (%p1080_p0), %s1017_s30, 256, %s1015_s29, %s453_s16, %s842_s10, %s842_s10, %s843_s23  }
 0x2d2 PF: > { %s481_s26 = sand.u32 1, %s819_s12   ;;  %p1081_p4 = scmp.ne.s32.totalorder %s1071_s25, 0 }
 0x2d3   : > { %p1082_p5 = scmp.ge.s32.totalorder %s831_s15, 2  ;;  %s482_s28 = scalar_lea.sflag [#allocation4], %s481_s26 }
 0x2d5   : > { %p629_p9 = pnand %p1082_p5, %p1081_p4 }
 0x2d7   : > { %p630_p10 = pneg %p629_p9 }
 0x2d9   : > { %814 = dma.done.wait (%p630_p10), %s482_s28, 256  }
 0x2da   : > { %816 = vsyncadd (%p630_p10), %s482_s28, 4294967040  ;;  %p17_p1 = scmp.ge.s32.totalorder %s889_s18, 4   ;;  %s1083_s12 = smov %s823_s13 }
 0x2db   : > { %s1084_s13 = smov %s827_s14  ;;  %s1085_s14 = smov %s901_s21 }
 0x2dc   : > { %s1086_s15 = smov %s889_s18  ;;  %19 = sbr.rel (!%p17_p1) target bundleno = 6 (0x6), region = 85 }
 0x2e1   :  { %487 = vsyncpa [#allocation3], 1 }
 0x2e2   :  { %489 = vsyncpa [#allocation3 + $0x1], 1 }
 0x2e3   :  { %490 = vsyncpa [#allocation6], 1 }
 0x2e4   :  { %491 = vsyncpa [#allocation4], 1 }
 0x2e5   :  { %493 = vsyncpa [#allocation4 + $0x1], 1 }

</bundles_post_ra>
